<compile_context>
chip_gen: v6e
topology: v6e:2x2x1
jax: 0.10.0
libtpu: 0.0.40
codegen_flags: <defaults>
</compile_context>

<pallas_src>
import jax
import jax.numpy as jnp
from jax.experimental import pallas as pl
from jax.experimental.pallas import tpu as pltpu

IN_F, H1, H2, H3, OUT_F = 28 * 28, 100, 500, 100, 1
# lane-padded (multiple-of-128) feature widths used inside the kernel
H1P, H2P, H3P, OUT_P = 128, 512, 128, 128


def _round_up(x, m):
    return ((x + m - 1) // m) * m


def _pad_to(a, shape):
    return jnp.pad(a, [(0, s - d) for d, s in zip(a.shape, shape)])


# ----------------------------- Pallas hot path ------------------------------
def _mlp_sigmoid_kernel(x_ref, w1_ref, b1_ref, w2_ref, b2_ref,
                        w3_ref, b3_ref, w4_ref, b4_ref, o_ref):
    # x is already bf16 (cast happened at the producer, so the DMA was bf16).
    # All weight refs are bf16 and zero-padded to lane multiples of 128; padded
    # columns stay exactly 0 through bias-add/ReLU, so they never contaminate
    # the real output column.
    x = x_ref[...]                                                      # (bm, 784) bf16

    # Linear(784,100)->pad 128, ReLU
    h = jnp.dot(x, w1_ref[...], preferred_element_type=jnp.float32) + b1_ref[...]
    h = jnp.maximum(h, 0.0)
    # Linear(100,500)->pad 512, ReLU
    h = jnp.dot(h.astype(jnp.bfloat16), w2_ref[...],
                preferred_element_type=jnp.float32) + b2_ref[...]
    h = jnp.maximum(h, 0.0)
    # Linear(500,100)->pad 128, ReLU
    h = jnp.dot(h.astype(jnp.bfloat16), w3_ref[...],
                preferred_element_type=jnp.float32) + b3_ref[...]
    h = jnp.maximum(h, 0.0)
    # Linear(100,1)->pad 128; only lane 0 of the logit slab is real.
    logit = jnp.dot(h.astype(jnp.bfloat16), w4_ref[...],
                    preferred_element_type=jnp.float32) + b4_ref[...]    # (bm, 128)
    # Transpose on the XLU and keep only row 0: the store is a lane-dense
    # (1, bm) block (4 B/row written back instead of 512 B/row).
    logit_t = jnp.transpose(logit)                                       # (128, bm)
    o_ref[...] = jax.nn.sigmoid(logit_t[0:1, :])                         # (1, bm)


def mlp_large0_pallas(x_flat, params, *, bm=1024):
    """x_flat: (B, 784) bfloat16 (cast at the producer, not here);
    params: lane-padded (bf16 weights, f32 biases).
    Returns sigmoid(MLP(x_flat)) of shape (B, 1) float32."""
    B, F = x_flat.shape
    assert F == IN_F
    assert x_flat.dtype == jnp.bfloat16, (
        "produce x in bf16 at the source so the kernel DMAs bf16 activations")
    w1, b1, w2, b2, w3, b3, w4, b4 = params

    # Batch tiling: clamp for small batches; if a single tile would cover the
    # whole (large-enough) batch, split into >=2 tiles so both TensorCores on
    # v7x get work and the pipeline has more than one step.
    bm = min(bm, _round_up(B, 8))
    if B <= bm and B >= 256:
        bm = _round_up(-(-B // 2), 128)
    Bp = _round_up(B, bm)
    if Bp != B:
        x_flat = jnp.pad(x_flat, ((0, Bp - B), (0, 0)))

    def resident(arr):
        # Whole-array block with a constant index_map: stays resident in VMEM.
        n = arr.ndim
        return pl.BlockSpec(arr.shape, lambda i, _n=n: (0,) * _n)

    out = pl.pallas_call(
        _mlp_sigmoid_kernel,
        out_shape=jax.ShapeDtypeStruct((1, Bp), jnp.float32),
        grid=(Bp // bm,),
        in_specs=[
            pl.BlockSpec((bm, IN_F), lambda i: (i, 0)),   # batch-tiled bf16 activations
            resident(w1), resident(b1),
            resident(w2), resident(b2),
            resident(w3), resident(b3),
            resident(w4), resident(b4),
        ],
        out_specs=pl.BlockSpec((1, bm), lambda i: (0, i)),
        compiler_params=pltpu.CompilerParams(
            dimension_semantics=("parallel",),
            vmem_limit_bytes=32 * 1024 * 1024),
    )(x_flat, w1, b1, w2, b2, w3, b3, w4, b4)

    # out is a (1, Bp) lane-dense slab of per-sample probabilities.
    return out[0, :B].reshape(B, OUT_F)


# ------------------------------- JAX glue -----------------------------------
def get_coordinates(x_flat):
    """JAX port of get_coordinates: indices of nonzero entries, dropping the batch
    column (torch.nonzero(x)[:, 1:].float()). One-hot rows => exactly B nonzeros,
    so we can use a static-size argwhere (torch.nonzero is dynamically shaped)."""
    idx = jnp.argwhere(x_flat != 0, size=x_flat.shape[0])  # (B, 2): (batch, flat_pos)
    # .squeeze(0) in the original is a no-op for B > 1
    return idx[:, 1:].astype(jnp.float32)                  # (B, 1)


def init_params(key):
    """Deterministic PyTorch-style init: U(-1/sqrt(fan_in), 1/sqrt(fan_in))."""
    def linear(k, fan_in, fan_out):
        kw, kb = jax.random.split(k)
        bound = 1.0 / (fan_in ** 0.5)
        w = jax.random.uniform(kw, (fan_in, fan_out), jnp.float32, -bound, bound)
        b = jax.random.uniform(kb, (1, fan_out), jnp.float32, -bound, bound)
        return w, b

    k1, k2, k3, k4 = jax.random.split(key, 4)
    w1, b1 = linear(k1, IN_F, H1)
    w2, b2 = linear(k2, H1, H2)
    w3, b3 = linear(k3, H2, H3)
    w4, b4 = linear(k4, H3, OUT_F)
    return (w1, b1, w2, b2, w3, b3, w4, b4)


def prepare_params(raw_params):
    """Zero-pad every layer to lane multiples of 128 and cast weights to bf16.
    Padded bias columns are 0, so padded lanes carry exact zeros through ReLU."""
    w1, b1, w2, b2, w3, b3, w4, b4 = raw_params
    return (
        _pad_to(w1, (IN_F, H1P)).astype(jnp.bfloat16), _pad_to(b1, (1, H1P)),
        _pad_to(w2, (H1P, H2P)).astype(jnp.bfloat16), _pad_to(b2, (1, H2P)),
        _pad_to(w3, (H2P, H3P)).astype(jnp.bfloat16), _pad_to(b3, (1, H3P)),
        _pad_to(w4, (H3P, OUT_P)).astype(jnp.bfloat16), _pad_to(b4, (1, OUT_P)),
    )


def forward(params_padded, x):
    """x: (B, 28, 28) one-hot maps (one nonzero per sample), bf16 at the producer."""
    B = x.shape[0]
    xf = x.reshape(B, -1)            # nn.Flatten -> (B, 784), stays bf16 (view)
    coords = get_coordinates(xf)     # (B, 1), faithful to the PyTorch helper
    # TODO(synk): the PyTorch forward feeds these (B,1) coordinates into
    # Linear(784,100), which is a shape mismatch (would raise in torch as well);
    # the only shape-consistent reading is that the 784-wide MLP consumes the
    # flattened one-hot itself, which is what the Pallas kernel does here.
    out = mlp_large0_pallas(xf, params_padded)
    return coords, out


# --------------------------------- demo -------------------------------------
if __name__ == "__main__":
    key = jax.random.PRNGKey(0)
    kparam, kpos = jax.random.split(key)

    params = prepare_params(init_params(kparam))

    B = 16
    pos = jax.random.randint(kpos, (B,), 0, IN_F)
    # Produce the input in bf16 at the producer (one-hot values 0/1 are exact in
    # bf16), so the kernel DMAs bf16 activations — no standalone cast before the
    # pallas_call.
    x = jax.nn.one_hot(pos, IN_F, dtype=jnp.bfloat16).reshape(B, 28, 28)

    coords, out = forward(params, x)
    out = jax.block_until_ready(out)
    coords = jax.block_until_ready(coords)

    assert out.shape == (B, 1) and coords.shape == (B, 1)
    assert bool(jnp.all((out > 0.0) & (out < 1.0)))
    print("KERNEL_OK")
</pallas_src>

<mosaic_0001>
module attributes {stable_mosaic.version = 11 : i64} {
  func.func @_mlp_sigmoid_kernel(%arg0: i32, %arg1: memref<16x784xbf16, #tpu.memory_space<vmem>>, %arg2: memref<784x128xbf16, #tpu.memory_space<vmem>>, %arg3: memref<1x128xf32, #tpu.memory_space<vmem>>, %arg4: memref<128x512xbf16, #tpu.memory_space<vmem>>, %arg5: memref<1x512xf32, #tpu.memory_space<vmem>>, %arg6: memref<512x128xbf16, #tpu.memory_space<vmem>>, %arg7: memref<1x128xf32, #tpu.memory_space<vmem>>, %arg8: memref<128x128xbf16, #tpu.memory_space<vmem>>, %arg9: memref<1x128xf32, #tpu.memory_space<vmem>>, %arg10: memref<1x16xf32, #tpu.memory_space<vmem>>) attributes {dimension_semantics = [#tpu.dimension_semantics<parallel>], iteration_bounds = array<i64: 1>, scalar_prefetch = 0 : i64, scratch_operands = 0 : i64, tpu.core_type = #tpu.core_type<tc>, window_params = [{transform_indices = @transform_0, window_bounds = array<i64: 16, 784>}, {pipeline_mode = #tpu.pipeline_mode<synchronous>, transform_indices = @transform_1, window_bounds = array<i64: 784, 128>}, {pipeline_mode = #tpu.pipeline_mode<synchronous>, transform_indices = @transform_2, window_bounds = array<i64: 1, 128>}, {pipeline_mode = #tpu.pipeline_mode<synchronous>, transform_indices = @transform_3, window_bounds = array<i64: 128, 512>}, {pipeline_mode = #tpu.pipeline_mode<synchronous>, transform_indices = @transform_4, window_bounds = array<i64: 1, 512>}, {pipeline_mode = #tpu.pipeline_mode<synchronous>, transform_indices = @transform_5, window_bounds = array<i64: 512, 128>}, {pipeline_mode = #tpu.pipeline_mode<synchronous>, transform_indices = @transform_6, window_bounds = array<i64: 1, 128>}, {pipeline_mode = #tpu.pipeline_mode<synchronous>, transform_indices = @transform_7, window_bounds = array<i64: 128, 128>}, {pipeline_mode = #tpu.pipeline_mode<synchronous>, transform_indices = @transform_8, window_bounds = array<i64: 1, 128>}, {transform_indices = @transform_9, window_bounds = array<i64: 1, 16>}]} {
    %c0 = arith.constant 0 : index
    %c0_0 = arith.constant 0 : index
    %0 = vector.load %arg1[%c0, %c0_0] : memref<16x784xbf16, #tpu.memory_space<vmem>>, vector<16x784xbf16>
    %c0_1 = arith.constant 0 : index
    %c0_2 = arith.constant 0 : index
    %1 = vector.load %arg2[%c0_1, %c0_2] : memref<784x128xbf16, #tpu.memory_space<vmem>>, vector<784x128xbf16>
    %cst = arith.constant dense<0.000000e+00> : vector<16x128xf32>
    %2 = tpu.matmul %0, %1, %cst {dimension_numbers = #tpu.dot_dimension_numbers<[1], [0], [0], [1], [0, 0, 1, 1], [], []>} : vector<16x784xbf16>, vector<784x128xbf16>, vector<16x128xf32> -> vector<16x128xf32>
    %c0_3 = arith.constant 0 : index
    %c0_4 = arith.constant 0 : index
    %3 = vector.load %arg3[%c0_3, %c0_4] : memref<1x128xf32, #tpu.memory_space<vmem>>, vector<1x128xf32>
    %4 = vector.broadcast %3 : vector<1x128xf32> to vector<16x128xf32>
    %5 = arith.addf %2, %4 : vector<16x128xf32>
    %cst_5 = arith.constant 0.000000e+00 : f32
    %6 = vector.broadcast %cst_5 : f32 to vector<16x128xf32>
    %7 = arith.maximumf %5, %6 : vector<16x128xf32>
    %8 = arith.truncf %7 : vector<16x128xf32> to vector<16x128xbf16>
    %c0_6 = arith.constant 0 : index
    %c0_7 = arith.constant 0 : index
    %9 = vector.load %arg4[%c0_6, %c0_7] : memref<128x512xbf16, #tpu.memory_space<vmem>>, vector<128x512xbf16>
    %cst_8 = arith.constant dense<0.000000e+00> : vector<16x512xf32>
    %10 = tpu.matmul %8, %9, %cst_8 {dimension_numbers = #tpu.dot_dimension_numbers<[1], [0], [0], [1], [0, 0, 1, 1], [], []>} : vector<16x128xbf16>, vector<128x512xbf16>, vector<16x512xf32> -> vector<16x512xf32>
    %c0_9 = arith.constant 0 : index
    %c0_10 = arith.constant 0 : index
    %11 = vector.load %arg5[%c0_9, %c0_10] : memref<1x512xf32, #tpu.memory_space<vmem>>, vector<1x512xf32>
    %12 = vector.broadcast %11 : vector<1x512xf32> to vector<16x512xf32>
    %13 = arith.addf %10, %12 : vector<16x512xf32>
    %cst_11 = arith.constant 0.000000e+00 : f32
    %14 = vector.broadcast %cst_11 : f32 to vector<16x512xf32>
    %15 = arith.maximumf %13, %14 : vector<16x512xf32>
    %16 = arith.truncf %15 : vector<16x512xf32> to vector<16x512xbf16>
    %c0_12 = arith.constant 0 : index
    %c0_13 = arith.constant 0 : index
    %17 = vector.load %arg6[%c0_12, %c0_13] : memref<512x128xbf16, #tpu.memory_space<vmem>>, vector<512x128xbf16>
    %cst_14 = arith.constant dense<0.000000e+00> : vector<16x128xf32>
    %18 = tpu.matmul %16, %17, %cst_14 {dimension_numbers = #tpu.dot_dimension_numbers<[1], [0], [0], [1], [0, 0, 1, 1], [], []>} : vector<16x512xbf16>, vector<512x128xbf16>, vector<16x128xf32> -> vector<16x128xf32>
    %c0_15 = arith.constant 0 : index
    %c0_16 = arith.constant 0 : index
    %19 = vector.load %arg7[%c0_15, %c0_16] : memref<1x128xf32, #tpu.memory_space<vmem>>, vector<1x128xf32>
    %20 = vector.broadcast %19 : vector<1x128xf32> to vector<16x128xf32>
    %21 = arith.addf %18, %20 : vector<16x128xf32>
    %cst_17 = arith.constant 0.000000e+00 : f32
    %22 = vector.broadcast %cst_17 : f32 to vector<16x128xf32>
    %23 = arith.maximumf %21, %22 : vector<16x128xf32>
    %24 = arith.truncf %23 : vector<16x128xf32> to vector<16x128xbf16>
    %c0_18 = arith.constant 0 : index
    %c0_19 = arith.constant 0 : index
    %25 = vector.load %arg8[%c0_18, %c0_19] : memref<128x128xbf16, #tpu.memory_space<vmem>>, vector<128x128xbf16>
    %cst_20 = arith.constant dense<0.000000e+00> : vector<16x128xf32>
    %26 = tpu.matmul %24, %25, %cst_20 {dimension_numbers = #tpu.dot_dimension_numbers<[1], [0], [0], [1], [0, 0, 1, 1], [], []>} : vector<16x128xbf16>, vector<128x128xbf16>, vector<16x128xf32> -> vector<16x128xf32>
    %c0_21 = arith.constant 0 : index
    %c0_22 = arith.constant 0 : index
    %27 = vector.load %arg9[%c0_21, %c0_22] : memref<1x128xf32, #tpu.memory_space<vmem>>, vector<1x128xf32>
    %28 = vector.broadcast %27 : vector<1x128xf32> to vector<16x128xf32>
    %29 = arith.addf %26, %28 : vector<16x128xf32>
    %30 = tpu.transpose %29, [1, 0] : vector<16x128xf32> -> vector<128x16xf32>
    %31 = vector.extract_strided_slice %30 {offsets = [0, 0], sizes = [1, 16], strides = [1, 1]} : vector<128x16xf32> to vector<1x16xf32>
    %32 = arith.negf %31 : vector<1x16xf32>
    %33 = math.exp %32 : vector<1x16xf32>
    %cst_23 = arith.constant 1.000000e+00 : f32
    %34 = vector.broadcast %cst_23 : f32 to vector<1x16xf32>
    %35 = arith.addf %34, %33 : vector<1x16xf32>
    %36 = arith.divf %34, %35 : vector<1x16xf32>
    %c0_24 = arith.constant 0 : index
    %c0_25 = arith.constant 0 : index
    %37 = vector.load %arg10[%c0_24, %c0_25] : memref<1x16xf32, #tpu.memory_space<vmem>>, vector<1x16xf32>
    tpu.vector_store %arg10[%c0_24, %c0_25], %36 {strides = array<i32>} : memref<1x16xf32, #tpu.memory_space<vmem>>, vector<1x16xf32>,
    return
  }
  func.func @transform_0(%arg0: i32) -> (i32, i32) {
    %c0_i32 = arith.constant 0 : i32
    %c0_i32_0 = arith.constant 0 : i32
    return %arg0, %c0_i32 : i32, i32
  }
  func.func @transform_1(%arg0: i32) -> (i32, i32) {
    %c0_i32 = arith.constant 0 : i32
    %c0_i32_0 = arith.constant 0 : i32
    %c0_i32_1 = arith.constant 0 : i32
    return %c0_i32, %c0_i32_0 : i32, i32
  }
  func.func @transform_2(%arg0: i32) -> (i32, i32) {
    %c0_i32 = arith.constant 0 : i32
    %c0_i32_0 = arith.constant 0 : i32
    %c0_i32_1 = arith.constant 0 : i32
    return %c0_i32, %c0_i32_0 : i32, i32
  }
  func.func @transform_3(%arg0: i32) -> (i32, i32) {
    %c0_i32 = arith.constant 0 : i32
    %c0_i32_0 = arith.constant 0 : i32
    %c0_i32_1 = arith.constant 0 : i32
    return %c0_i32, %c0_i32_0 : i32, i32
  }
  func.func @transform_4(%arg0: i32) -> (i32, i32) {
    %c0_i32 = arith.constant 0 : i32
    %c0_i32_0 = arith.constant 0 : i32
    %c0_i32_1 = arith.constant 0 : i32
    return %c0_i32, %c0_i32_0 : i32, i32
  }
  func.func @transform_5(%arg0: i32) -> (i32, i32) {
    %c0_i32 = arith.constant 0 : i32
    %c0_i32_0 = arith.constant 0 : i32
    %c0_i32_1 = arith.constant 0 : i32
    return %c0_i32, %c0_i32_0 : i32, i32
  }
  func.func @transform_6(%arg0: i32) -> (i32, i32) {
    %c0_i32 = arith.constant 0 : i32
    %c0_i32_0 = arith.constant 0 : i32
    %c0_i32_1 = arith.constant 0 : i32
    return %c0_i32, %c0_i32_0 : i32, i32
  }
  func.func @transform_7(%arg0: i32) -> (i32, i32) {
    %c0_i32 = arith.constant 0 : i32
    %c0_i32_0 = arith.constant 0 : i32
    %c0_i32_1 = arith.constant 0 : i32
    return %c0_i32, %c0_i32_0 : i32, i32
  }
  func.func @transform_8(%arg0: i32) -> (i32, i32) {
    %c0_i32 = arith.constant 0 : i32
    %c0_i32_0 = arith.constant 0 : i32
    %c0_i32_1 = arith.constant 0 : i32
    return %c0_i32, %c0_i32_0 : i32, i32
  }
  func.func @transform_9(%arg0: i32) -> (i32, i32) {
    %c0_i32 = arith.constant 0 : i32
    %c0_i32_0 = arith.constant 0 : i32
    return %c0_i32, %arg0 : i32, i32
  }
}

</mosaic_0001>

<bundles_post_ra>
// kernel: tpu_custom_call.1
= control target key start
LH: loop header
LB: loop body
LE: loop exit
PB: predicated region body
PF: predicated region fallthrough
CT: control target
= control target key end

     0   :  { %14 = vsyncpa [#allocation3], 0  ;;  %s2235_s0 = inlined_call_operand.hbm [shape: bf16[16,784], index: 0, kind: input, shape index: {}]   ;;  %s2236_s1 = inlined_call_operand.hbm [shape: bf16[784,128], index: 1, kind: input, shape index: {}]   ;;  %s2237_s2 = inlined_call_operand.vmem [shape: f32[1,128], index: 2, kind: input, shape index: {}]   ;;  %s2238_s3 = inlined_call_operand.hbm [shape: bf16[128,512], index: 3, kind: input, shape index: {}]   ;;  %s2239_s4 = inlined_call_operand.vmem [shape: f32[1,512], index: 4, kind: input, shape index: {}]   ;;  %s2240_s5 = inlined_call_operand.hbm [shape: bf16[512,128], index: 5, kind: input, shape index: {}]   ;;  %s2241_s6 = inlined_call_operand.vmem [shape: f32[1,128], index: 6, kind: input, shape index: {}]   ;;  %s2242_s7 = inlined_call_operand.hbm [shape: bf16[128,128], index: 7, kind: input, shape index: {}]   ;;  %s2243_s8 = inlined_call_operand.vmem [shape: f32[1,128], index: 8, kind: input, shape index: {}]   ;;  %s2244_s9 = inlined_call_operand.hbm [shape: f32[1,16], index: 9, kind: output, shape index: {}]  }
   0x1   :  { %15 = vsyncpa [#allocation6], 0 }
   0x2   :  { %16 = vsyncpa [#allocation9], 0 }
   0x3   :  { %17 = vsyncpa [#allocation4], 0  ;;  %s2118_s30 = smov [#allocation5]  }
   0x4   :  { %s35_s10 = sshll.u32 %s2118_s30, 4  ;;  %s36_s10 = int_to_ptr.vmem [resolvable:$true] %s35_s10 }
   0x5   :  { %s1998_s11 = scalar_lea.vmem %s36_s10, 6272  ;;  %p2003_p1 = scmp.lt.s32.totalorder %s36_s10, %s36_s10 }
   0x6   :  { %p1999_p0 = scmp.ne.s32.totalorder %s36_s10, %s1998_s11  ;;  %p2004_p2 = scmp.lt.s32.totalorder %s1998_s11, %s1998_s11 }
   0x8   :  { %p2005_p3 = por %p2004_p2, %p2003_p1 }
   0xa   :  { %p2006_p4 = pnand %p2005_p3, %p1999_p0 }
   0xc   :  { %2009 = shalt.err (!%p2006_p4)
}
   0xd   :  { %s2119_s12 = smov 64   ;;  %s2120_s13 = smov 4  }
   0xe   :  { %41 = dma.hbm_to_vmem [thread:$0]  %s2236_s1, 6272, %s36_s10, [#allocation6], %s2119_s12, %s2119_s12, %s2120_s13  }
   0xf   :  { %s2121_s16 = smov [#allocation8]   ;;  %s2122_s18 = smov [#allocation2]  }
  0x10   :  { %s63_s17 = sshll.u32 %s2121_s16, 4  ;;  %s23_s19 = sshll.u32 %s2122_s18, 4  ;;  %s64_s17 = int_to_ptr.vmem [resolvable:$true] %s63_s17  ;;  %s24_s19 = int_to_ptr.vmem [resolvable:$true] %s23_s19 }
  0x11   :  { %s2018_s20 = scalar_lea.vmem %s64_s17, 4096  ;;  %p2023_p6 = scmp.lt.s32.totalorder %s64_s17, %s64_s17 }
  0x12   :  { %p2019_p5 = scmp.ne.s32.totalorder %s64_s17, %s2018_s20  ;;  %p2024_p7 = scmp.lt.s32.totalorder %s2018_s20, %s2018_s20 }
  0x14   :  { %p2025_p8 = por %p2024_p7, %p2023_p6 }
  0x16   :  { %p2026_p9 = pnand %p2025_p8, %p2019_p5 }
  0x18   :  { %2029 = shalt.err (!%p2026_p9)
}
  0x19   :  { %69 = dma.hbm_to_vmem [thread:$0]  %s2240_s5, 4096, %s64_s17, [#allocation9], %s2119_s12, %s2119_s12, %s2120_s13  }
  0x1a   :  { %s2038_s1 = scalar_lea.vmem %s24_s19, 896  ;;  %p2043_p11 = scmp.lt.s32.totalorder %s24_s19, %s24_s19 }
  0x1b   :  { %p2039_p10 = scmp.ne.s32.totalorder %s24_s19, %s2038_s1  ;;  %p2044_p12 = scmp.lt.s32.totalorder %s2038_s1, %s2038_s1 }
  0x1d   :  { %p2045_p13 = por %p2044_p12, %p2043_p11 }
  0x1f   :  { %p2046_p0 = pnand %p2045_p13, %p2039_p10 }
  0x21   :  { %2049 = shalt.err (!%p2046_p0)
}
  0x22   :  { %s2123_s23 = smov 448   ;;  %s2124_s24 = smov 28  }
  0x23   :  { %29 = dma.hbm_to_vmem [thread:$0]  %s2235_s0, 896, %s24_s19, [#allocation3], %s2123_s23, %s2123_s23, %s2124_s24  }
  0x24   :  { %s2125_s27 = smov [#allocation7]  }
  0x25   :  { %s49_s28 = sshll.u32 %s2125_s27, 4  ;;  %s50_s28 = int_to_ptr.vmem [resolvable:$true] %s49_s28 }
  0x26   :  { %s2058_s29 = scalar_lea.vmem %s50_s28, 4096  ;;  %p2063_p2 = scmp.lt.s32.totalorder %s50_s28, %s50_s28 }
  0x27   :  { %p2059_p1 = scmp.ne.s32.totalorder %s50_s28, %s2058_s29  ;;  %p2064_p3 = scmp.lt.s32.totalorder %s2058_s29, %s2058_s29 }
  0x29   :  { %p2065_p4 = por %p2064_p3, %p2063_p2 }
  0x2b   :  { %p2066_p5 = pnand %p2065_p4, %p2059_p1 }
  0x2d   :  { %2069 = shalt.err (!%p2066_p5)
}
  0x2e   :  { %s2126_s5 = smov 256   ;;  %s2127_s30 = smov 16  }
  0x2f   :  { %55 = dma.hbm_to_vmem [thread:$0]  %s2238_s3, 4096, %s50_s28, [#allocation6], %s2126_s5, %s2126_s5, %s2127_s30  }
  0x30   :  { %s2128_s14 = smov [#allocation10]  }
  0x31   :  { %s77_s15 = sshll.u32 %s2128_s14, 4  ;;  %s78_s15 = int_to_ptr.vmem [resolvable:$true] %s77_s15 }
  0x32   :  { %s2078_s0 = scalar_lea.vmem %s78_s15, 1024  ;;  %p2083_p7 = scmp.lt.s32.totalorder %s78_s15, %s78_s15 }
  0x33   :  { %p2079_p6 = scmp.ne.s32.totalorder %s78_s15, %s2078_s0  ;;  %p2084_p8 = scmp.lt.s32.totalorder %s2078_s0, %s2078_s0 }
  0x35   :  { %p2085_p9 = por %p2084_p8, %p2083_p7 }
  0x37   :  { %p2086_p10 = pnand %p2085_p9, %p2079_p6 }
  0x39   :  { %2089 = shalt.err (!%p2086_p10)
}
  0x3a   :  { %83 = dma.hbm_to_vmem [thread:$0]  %s2242_s7, 1024, %s78_s15, [#allocation9], %s2119_s12, %s2119_s12, %s2120_s13  }
  0x3b   :  { %2110 = dma.done.wait [#allocation3], 896  }
  0x3c   :  { %2111 = vsyncadd [#allocation3], 4294966400 }
  0x3d   :  { %2112 = dma.done.wait [#allocation6], 10368  }
  0x3e   :  { %2113 = vsyncadd [#allocation6], 4294956928 }
  0x3f   :  { %2114 = dma.done.wait [#allocation9], 5120  }
  0x40   :  { %2115 = vsyncadd [#allocation9], 4294962176  ;;  %v1839_v0 = vld [vmem:[#allocation5 + $0x78] sm:$0xff]   ;;  %v1843_v4 = vld [vmem:[#allocation5 + $0x70] sm:$0xff]   ;;  %v2129_v38 = vmov 0.0   ;;  %vm2130_vm0 = vmmov 0  }
  0x41   :  { %v1840_v1 = vld [vmem:[#allocation5 + $0x38] sm:$0xff]   ;;  %1677 = vmatprep.subr.bf16.mxu0 %v1839_v0  ;;  %v1844_v5 = vld [vmem:[#allocation5 + $0x30] sm:$0xff]   ;;  %v1847_v8 = vld [vmem:[#allocation5 + $0x68] sm:$0xff]   ;;  %vm544_vm1 = vcmask 130048   ;;  %s2132_s19 = smov [#allocation11]   ;;  %vm1525_vm2 = vcmask 122880  }
  0x42   :  { %v1841_v2 = vld [vmem:[#allocation5 + $0xf8] sm:$0xff]   ;;  %1678 = vmatpush3.bf16.msra.mxu0 %v1840_v1  ;;  %v1845_v6 = vld [vmem:[#allocation5 + $0xf0] sm:$0xff]   ;;  %v1848_v9 = vld [vmem:[#allocation5 + $0x28] sm:$0xff]   ;;  %s1533_s20 = sshll.u32 %s2132_s19, 4  ;;  %s1534_s20 = int_to_ptr.vmem [resolvable:$true] %s1533_s20 }
  0x43   :  { %v1842_v3 = vld [vmem:[#allocation5 + $0xb8] sm:$0xff]   ;;  %1699 = vmatprep.subr.bf16.mxu1 %v1841_v2  ;;  %1679 = vmatprep.subr.bf16.mxu0 %v1843_v4  ;;  %v1846_v7 = vld [vmem:[#allocation5 + $0xb0] sm:$0xff]   ;;  %v1849_v10 = vld [vmem:[#allocation5 + $0xe8] sm:$0xff]   ;;  %s2094_s21 = scalar_lea.vmem %s1534_s20, 32  ;;  %p2095_p12 = scmp.lt.s32.totalorder %s1534_s20, %s1534_s20 }
  0x44   :  { %1700 = vmatpush3.bf16.msra.mxu1 %v1842_v3  ;;  %v1850_v11 = vld [vmem:[#allocation5 + $0xa8] sm:$0xff]   ;;  %v1851_v12 = vld [vmem:[#allocation5 + $0x60] sm:$0xff]   ;;  %v1855_v16 = vld [vmem:[#allocation5 + $0x58] sm:$0xff]  }
  0x45   :  { %1701 = vmatprep.subr.bf16.mxu1 %v1845_v6  ;;  %v1852_v13 = vld [vmem:[#allocation5 + $0x20] sm:$0xff]   ;;  %v1856_v17 = vld [vmem:[#allocation5 + $0x18] sm:$0xff]   ;;  %v1859_v20 = vld [vmem:[#allocation5 + $0x50] sm:$0xff]  }
  0x46   :  { %1680 = vmatpush3.bf16.msra.mxu0 %v1844_v5  ;;  %v1853_v14 = vld [vmem:[#allocation5 + $0xe0] sm:$0xff]   ;;  %v1857_v18 = vld [vmem:[#allocation5 + $0xd8] sm:$0xff]   ;;  %v1860_v21 = vld [vmem:[#allocation5 + $0x10] sm:$0xff]  }
  0x47   :  { %1681 = vmatprep.subr.bf16.mxu0 %v1847_v8  ;;  %v1854_v15 = vld [vmem:[#allocation5 + $0xa0] sm:$0xff]   ;;  %v1858_v19 = vld [vmem:[#allocation5 + $0x98] sm:$0xff]   ;;  %v1861_v22 = vld [vmem:[#allocation5 + $0xd0] sm:$0xff]  }
  0x48   :  { %1702 = vmatpush3.bf16.msra.mxu1 %v1846_v7  ;;  %v1862_v23 = vld [vmem:[#allocation5 + $0x90] sm:$0xff]   ;;  %v1863_v24 = vld [vmem:[#allocation5 + $0x48] sm:$0xff]   ;;  %v1867_v28 = vld [vmem:[#allocation5 + $0x40] sm:$0xff]  }
  0x49   :  { %1703 = vmatprep.subr.bf16.mxu1 %v1849_v10  ;;  %v1864_v25 = vld [vmem:[#allocation5 + $0x8] sm:$0xff]   ;;  %v1868_v29 = vld [vmem:[#allocation5] sm:$0xff]   ;;  %v1874_v34 = vld [vmem:[#allocation5 + $0x178] sm:$0xff]  }
  0x4a   :  { %1682 = vmatpush3.bf16.msra.mxu0 %v1848_v9  ;;  %v1865_v26 = vld [vmem:[#allocation5 + $0xc8] sm:$0xff]   ;;  %v1869_v30 = vld [vmem:[#allocation5 + $0xc0] sm:$0xff]   ;;  %v1877_v36 = vld [vmem:[#allocation2 + $0xc] ss:$28 sps:$4 sm:$0xff]  }
  0x4b   :  { %1683 = vmatprep.subr.bf16.mxu0 %v1851_v12  ;;  %v1866_v27 = vld [vmem:[#allocation5 + $0x88] sm:$0xff]   ;;  %v1873_v33 = vld [vmem:[#allocation5 + $0x80] sm:$0xff]   ;;  %v1878_v37 = vld [vmem:[#allocation5 + $0x138] sm:$0xff]   ;;  %621 = vmatprep.mubr.bf16.mxu1 %v1877_v36 }
  0x4c   :  { %1704 = vmatpush3.bf16.msra.mxu1 %v1850_v11  ;;  %v1870_v31 = vld [vmem:[#allocation2] ss:$28 sps:$4 sm:$0xff]   ;;  %v1875_v35 = vld [vmem:[#allocation2 + $0x8] ss:$28 sps:$4 sm:$0xff]   ;;  %v1885_v45 = vld [vmem:[#allocation5 + $0x158] sm:$0xff]  }
  0x4d   :  { %1705 = vmatprep.subr.bf16.mxu1 %v1853_v14  ;;  %v1872_v32 = vld [vmem:[#allocation2 + $0x4] ss:$28 sps:$4 sm:$0xff]   ;;  %v1879_v39 = vld [vmem:[#allocation5 + $0x170] sm:$0xff]   ;;  %v1883_v43 = vld [vmem:[#allocation5 + $0x160] sm:$0xff]  }
  0x4e   :  { %1684 = vmatpush3.bf16.msra.mxu0 %v1852_v13  ;;  %580 = vmatprep.mubr.bf16.mxu0 %v1872_v32  ;;  %v1880_v40 = vld [vmem:[#allocation5 + $0x130] sm:$0xff]   ;;  %v1881_v41 = vld [vmem:[#allocation5 + $0x168] sm:$0xff]   ;;  %v1884_v44 = vld [vmem:[#allocation5 + $0x120] sm:$0xff]  }
  0x4f   :  { %1685 = vmatprep.subr.bf16.mxu0 %v1855_v16  ;;  %v1882_v42 = vld [vmem:[#allocation5 + $0x128] sm:$0xff]   ;;  %v1886_v46 = vld [vmem:[#allocation5 + $0x118] sm:$0xff]   ;;  %v1887_v47 = vld [vmem:[#allocation5 + $0x150] sm:$0xff]  }
  0x50   :  { %1706 = vmatpush3.bf16.msra.mxu1 %v1854_v15  ;;  %v1893_v48 = vld [vmem:[#allocation5 + $0x180] sm:$0xff]   ;;  %v1888_v49 = vld [vmem:[#allocation5 + $0x110] sm:$0xff]   ;;  %v1896_v50 = vld [vmem:[#allocation2 + $0x14] ss:$28 sps:$4 sm:$0xff]  }
  0x51   :  { %1707 = vmatprep.subr.bf16.mxu1 %v1857_v18  ;;  %v1889_v51 = vld [vmem:[#allocation5 + $0x148] sm:$0xff]   ;;  %v1897_v52 = vld [vmem:[#allocation2 + $0x18] ss:$28 sps:$4 sm:$0xff]   ;;  %v1894_v56 = vld [vmem:[#allocation2 + $0x10] ss:$28 sps:$4 sm:$0xff]  }
  0x52   :  { %1686 = vmatpush3.bf16.msra.mxu0 %v1856_v17  ;;  %v1890_v53 = vld [vmem:[#allocation5 + $0x108] sm:$0xff]   ;;  %v1891_v54 = vld [vmem:[#allocation5 + $0x140] sm:$0xff]  }
  0x53   :  { %1687 = vmatprep.subr.bf16.mxu0 %v1859_v20  ;;  %v1892_v55 = vld [vmem:[#allocation5 + $0x100] sm:$0xff]   ;;  %v1898_v57 = vld [vmem:[#allocation7 + $0xe0] ss:$16 sps:$4 sm:$0xff]   ;;  %v1900_v58 = vld [vmem:[#allocation7 + $0xe4] ss:$16 sps:$4 sm:$0xff]  }
  0x54   :  { %1708 = vmatpush3.bf16.msra.mxu1 %v1858_v19  ;;  %v1901_v59 = vld [vmem:[#allocation7 + $0xe8] ss:$16 sps:$4 sm:$0xff]   ;;  %v1903_v60 = vld [vmem:[#allocation7 + $0xec] ss:$16 sps:$4 sm:$0xff]   ;;  %v1906_v61 = vld [vmem:[#allocation7 + $0xc4] ss:$16 sps:$4 sm:$0xff]  }
  0x55   :  { %1709 = vmatprep.subr.bf16.mxu1 %v1861_v22  ;;  %v1909_v62 = vld [vmem:[#allocation7 + $0xcc] ss:$16 sps:$4 sm:$0xff]   ;;  %v1904_v63 = vld [vmem:[#allocation7 + $0xc0] ss:$16 sps:$4 sm:$0xff]   ;;  %v1907_v0 = vld [vmem:[#allocation7 + $0xc8] ss:$16 sps:$4 sm:$0xff]  }
  0x56   :  { %1688 = vmatpush3.bf16.msra.mxu0 %v1860_v21  ;;  %v1912_v1 = vld [vmem:[#allocation7 + $0xa4] ss:$16 sps:$4 sm:$0xff]   ;;  %v1915_v2 = vld [vmem:[#allocation7 + $0xac] ss:$16 sps:$4 sm:$0xff]   ;;  %v1910_v3 = vld [vmem:[#allocation7 + $0xa0] ss:$16 sps:$4 sm:$0xff]  }
  0x57   :  { %1689 = vmatprep.subr.bf16.mxu0 %v1863_v24  ;;  %v1913_v4 = vld [vmem:[#allocation7 + $0xa8] ss:$16 sps:$4 sm:$0xff]   ;;  %v1918_v5 = vld [vmem:[#allocation7 + $0x84] ss:$16 sps:$4 sm:$0xff]   ;;  %v1921_v6 = vld [vmem:[#allocation7 + $0x8c] ss:$16 sps:$4 sm:$0xff]  }
  0x58   :  { %1710 = vmatpush3.bf16.msra.mxu1 %v1862_v23  ;;  %v1916_v7 = vld [vmem:[#allocation7 + $0x80] ss:$16 sps:$4 sm:$0xff]   ;;  %v1919_v8 = vld [vmem:[#allocation7 + $0x88] ss:$16 sps:$4 sm:$0xff]   ;;  %v1924_v9 = vld [vmem:[#allocation7 + $0x64] ss:$16 sps:$4 sm:$0xff]  }
  0x59   :  { %1711 = vmatprep.subr.bf16.mxu1 %v1865_v26  ;;  %v1927_v10 = vld [vmem:[#allocation7 + $0x6c] ss:$16 sps:$4 sm:$0xff]   ;;  %v1922_v11 = vld [vmem:[#allocation7 + $0x60] ss:$16 sps:$4 sm:$0xff]   ;;  %v1925_v12 = vld [vmem:[#allocation7 + $0x68] ss:$16 sps:$4 sm:$0xff]  }
  0x5a   :  { %1690 = vmatpush3.bf16.msra.mxu0 %v1864_v25  ;;  %v1930_v13 = vld [vmem:[#allocation7 + $0x44] ss:$16 sps:$4 sm:$0xff]   ;;  %v1933_v14 = vld [vmem:[#allocation7 + $0x4c] ss:$16 sps:$4 sm:$0xff]   ;;  %v1928_v15 = vld [vmem:[#allocation7 + $0x40] ss:$16 sps:$4 sm:$0xff]  }
  0x5b   :  { %1691 = vmatprep.subr.bf16.mxu0 %v1867_v28  ;;  %v1931_v16 = vld [vmem:[#allocation7 + $0x48] ss:$16 sps:$4 sm:$0xff]   ;;  %v1936_v17 = vld [vmem:[#allocation7 + $0x24] ss:$16 sps:$4 sm:$0xff]   ;;  %v1939_v18 = vld [vmem:[#allocation7 + $0x2c] ss:$16 sps:$4 sm:$0xff]  }
  0x5c   :  { %1712 = vmatpush3.bf16.msra.mxu1 %v1866_v27  ;;  %v1934_v19 = vld [vmem:[#allocation7 + $0x20] ss:$16 sps:$4 sm:$0xff]   ;;  %v1937_v20 = vld [vmem:[#allocation7 + $0x28] ss:$16 sps:$4 sm:$0xff]   ;;  %v1942_v21 = vld [vmem:[#allocation7 + $0x4] ss:$16 sps:$4 sm:$0xff]  }
  0x5d   :  { %1713 = vmatprep.subr.bf16.mxu1 %v1869_v30  ;;  %v1945_v22 = vld [vmem:[#allocation7 + $0xc] ss:$16 sps:$4 sm:$0xff]   ;;  %v1940_v23 = vld [vmem:[#allocation7] ss:$16 sps:$4 sm:$0xff]   ;;  %v1943_v24 = vld [vmem:[#allocation7 + $0x8] ss:$16 sps:$4 sm:$0xff]  }
  0x5e   :  { %1692 = vmatpush3.bf16.msra.mxu0 %v1868_v29  ;;  %v2131_v25 = vmov 0   ;;  %v1946_v26 = vld [vmem:[#allocation8 + $0x78] sm:$0xff]  }
  0x5f   :  { %1721 = vmatprep.subr.bf16.mxu0 %v1874_v34  ;;  %v1947_v27 = vld [vmem:[#allocation8 + $0xf8] sm:$0xff]  }
  0x60   :  { %1714 = vmatpush3.bf16.msra.mxu1 %v1873_v33 }
  0x61   :  { %581 = vmatmul.mubr.bf16.vlgmr.msra.gmra.mxu0 %v1870_v31  ;;  %1798 = vmatprep.subr.bf16.mxu1 %v2129_v38 }
  0x62   :  { %1722 = vmatpush3.bf16.msra.mxu0 %v1878_v37  ;;  %662 = vmatprep.mubr.bf16.mxu0 %v1896_v50 }
  0x63   :  { %622 = vmatmul.mubr.bf16.vlgmr.msra.gmra.mxu1 %v1875_v35  ;;  %1723 = vmatprep.subr.bf16.mxu0 %v1879_v39 }
  0x64   :  { %1800 = vmatprep.mubr.msk.bf16.mxu1 %vm2130_vm0, %v2129_v38  ;;  %1799 = vmatpush3.bf16.msra.mxu1 %v1893_v48 }
  0x65   :  { %929 = vmatprep.subr.bf16.mxu1 %v1900_v58 }
  0x66   :  { %1724 = vmatpush3.bf16.msra.mxu0 %v1880_v40 }
  0x67   :  { %1725 = vmatprep.subr.bf16.mxu0 %v1881_v41  ;;  %v1544_v41 = vld [vmem:[%s2237_s2] ss:$0 sm:$0xff] }
  0x6a   :  { %1726 = vmatpush3.bf16.msra.mxu0 %v1882_v42 }
  0x6b   :  { %1727 = vmatprep.subr.bf16.mxu0 %v1883_v43  ;;  %1801 = vmatmul.mubr.msk.bf16.vlgmr.msra.gmra.mxu1 %vm544_vm1, %v1897_v52 }
  0x6c   :  { %930 = vmatpush1.bf16.msra.mxu1 %v1898_v57  ;;  %961 = vmatprep.mubr.bf16.mxu1 %v2131_v25 }
  0x6d   :  { %931 = vmatprep.subr.bf16.mxu1 %v1906_v61 }
  0x6e   :  { %1728 = vmatpush3.bf16.msra.mxu0 %v1884_v44 }
  0x6f   :  { %1729 = vmatprep.subr.bf16.mxu0 %v1885_v45 }
  0x70   :  { %932 = vmatpush1.bf16.msra.mxu1 %v1904_v63  ;;  %v1949_v63 = vld [vmem:[#allocation8 + $0xb8] sm:$0xff]  }
  0x71   :  { %933 = vmatprep.subr.bf16.mxu1 %v1912_v1  ;;  %v1950_v1 = vld [vmem:[#allocation8 + $0x70] sm:$0xff]  }
  0x72   :  { %1730 = vmatpush3.bf16.msra.mxu0 %v1886_v46 }
  0x73   :  { %1731 = vmatprep.subr.bf16.mxu0 %v1887_v47 }
  0x74   :  { %934 = vmatpush1.bf16.msra.mxu1 %v1910_v3  ;;  %v1952_v3 = vld [vmem:[#allocation8 + $0x30] sm:$0xff]  }
  0x75   :  { %935 = vmatprep.subr.bf16.mxu1 %v1918_v5  ;;  %v1954_v5 = vld [vmem:[#allocation8 + $0x68] sm:$0xff]  }
  0x76   :  { %1732 = vmatpush3.bf16.msra.mxu0 %v1888_v49 }
  0x77   :  { %1733 = vmatprep.subr.bf16.mxu0 %v1889_v51 }
  0x78   :  { %936 = vmatpush1.bf16.msra.mxu1 %v1916_v7  ;;  %v1956_v7 = vld [vmem:[#allocation8 + $0x28] sm:$0xff]  }
  0x79   :  { %937 = vmatprep.subr.bf16.mxu1 %v1924_v9  ;;  %v1958_v9 = vld [vmem:[#allocation8 + $0x60] sm:$0xff]  }
  0x7a   :  { %1734 = vmatpush3.bf16.msra.mxu0 %v1890_v53 }
  0x7b   :  { %1735 = vmatprep.subr.bf16.mxu0 %v1891_v54 }
  0x7c   :  { %938 = vmatpush1.bf16.msra.mxu1 %v1922_v11  ;;  %v1960_v11 = vld [vmem:[#allocation8 + $0x20] sm:$0xff]  }
  0x7d   :  { %939 = vmatprep.subr.bf16.mxu1 %v1930_v13  ;;  %v1962_v13 = vld [vmem:[#allocation8 + $0x58] sm:$0xff]  }
  0x7e   :  { %1736 = vmatpush3.bf16.msra.mxu0 %v1892_v55 }
  0x7f   :  { %972 = vmatprep.subr.bf16.mxu0 %v1903_v60 }
  0x80   :  { %940 = vmatpush1.bf16.msra.mxu1 %v1928_v15  ;;  %v1964_v15 = vld [vmem:[#allocation8 + $0x18] sm:$0xff]  }
  0x81   :  { %663 = vmatmul.mubr.bf16.vlgmr.msra.gmra.mxu0 %v1894_v56  ;;  %941 = vmatprep.subr.bf16.mxu1 %v1936_v17  ;;  %v1966_v17 = vld [vmem:[#allocation8 + $0x50] sm:$0xff]  }
  0x82   :  { %973 = vmatpush1.bf16.msra.mxu0 %v1901_v59  ;;  %1004 = vmatprep.mubr.bf16.mxu0 %v2131_v25  ;;  %v1974_v25 = vld [vmem:[#allocation8 + $0x40] sm:$0xff]  }
  0x83   :  { %974 = vmatprep.subr.bf16.mxu0 %v1909_v62  ;;  %v1948_v62 = vld [vmem:[#allocation8 + $0x38] sm:$0xff]  }
  0x84   :  { %942 = vmatpush1.bf16.msra.mxu1 %v1934_v19  ;;  %v1968_v19 = vld [vmem:[#allocation8 + $0x10] sm:$0xff]  }
  0x85   :  { %943 = vmatprep.subr.bf16.mxu1 %v1942_v21  ;;  %v1970_v21 = vld [vmem:[#allocation8 + $0x48] sm:$0xff]  }
  0x86   :  { %975 = vmatpush1.bf16.msra.mxu0 %v1907_v0 }
  0x87   :  { %976 = vmatprep.subr.bf16.mxu0 %v1915_v2  ;;  %v1951_v2 = vld [vmem:[#allocation8 + $0xf0] sm:$0xff]  }
  0x88   :  { %944 = vmatpush1.bf16.msra.mxu1 %v1940_v23  ;;  %v1972_v23 = vld [vmem:[#allocation8 + $0x8] sm:$0xff]  }
  0x89   :  { %1745 = vmatprep.subr.bf16.mxu1 %v1946_v26  ;;  %v1975_v26 = vld [vmem:[#allocation8 + $0xc0] sm:$0xff]  }
  0x8a   :  { %977 = vmatpush1.bf16.msra.mxu0 %v1913_v4  ;;  %v1953_v4 = vld [vmem:[#allocation8 + $0xb0] sm:$0xff]  }
  0x8b   :  { %978 = vmatprep.subr.bf16.mxu0 %v1921_v6  ;;  %v1955_v6 = vld [vmem:[#allocation8 + $0xe8] sm:$0xff]  }
  0x8e   :  { %979 = vmatpush1.bf16.msra.mxu0 %v1919_v8  ;;  %v1957_v8 = vld [vmem:[#allocation8 + $0xa8] sm:$0xff]  }
  0x8f   :  { %980 = vmatprep.subr.bf16.mxu0 %v1927_v10  ;;  %v1959_v10 = vld [vmem:[#allocation8 + $0xe0] sm:$0xff]  }
  0x92   :  { %981 = vmatpush1.bf16.msra.mxu0 %v1925_v12  ;;  %v1961_v12 = vld [vmem:[#allocation8 + $0xa0] sm:$0xff]  }
  0x93   :  { %982 = vmatprep.subr.bf16.mxu0 %v1933_v14  ;;  %v1963_v14 = vld [vmem:[#allocation8 + $0xd8] sm:$0xff]  }
  0x96   :  { %983 = vmatpush1.bf16.msra.mxu0 %v1931_v16  ;;  %v1965_v16 = vld [vmem:[#allocation8 + $0x98] sm:$0xff]  }
  0x97   :  { %984 = vmatprep.subr.bf16.mxu0 %v1939_v18  ;;  %v1967_v18 = vld [vmem:[#allocation8 + $0xd0] sm:$0xff]  }
  0x9a   :  { %985 = vmatpush1.bf16.msra.mxu0 %v1937_v20  ;;  %v1969_v20 = vld [vmem:[#allocation8 + $0x90] sm:$0xff]  }
  0x9b   :  { %986 = vmatprep.subr.bf16.mxu0 %v1945_v22  ;;  %v1971_v22 = vld [vmem:[#allocation8 + $0xc8] sm:$0xff]  }
  0x9e   :  { %987 = vmatpush1.bf16.msra.mxu0 %v1943_v24  ;;  %v1973_v24 = vld [vmem:[#allocation8 + $0x88] sm:$0xff]  }
  0x9f   :  { %1767 = vmatprep.subr.bf16.mxu0 %v1947_v27  ;;  %v1976_v27 = vld [vmem:[#allocation8] sm:$0xff]  }
 0x121   :  { %v1693_v31 = vpop.f32.mrf.mxu0 }
 0x123   :  { %v1715_v28 = vpop.f32.mrf.mxu1  ;;  %v1694_v34 = vpop.f32.mrf.mxu0 }
 0x124   :  { %v1695_v40 = vadd.f32 %v1694_v34, %v1693_v31 }
 0x125   :  { %v1716_v29 = vpop.f32.mrf.mxu1  ;;  %v1696_v37 = vpop.f32.mrf.mxu0 }
 0x126   :  { %v583_v43 = vadd.f32 %v1695_v40, %v1544_v41  ;;  %v1717_v44 = vadd.f32 %v1716_v29, %v1715_v28  ;;  %v1977_v28 = vld [vmem:[#allocation8 + $0x80] sm:$0xff]   ;;  %v749_v29 = vlaneseq }
 0x127   :  { %v1718_v30 = vpop.f32.mrf.mxu1  ;;  %v1697_v42 = vpop.f32.mrf.mxu0 }
 0x128   :  { %v1698_v45 = vadd.f32 %v1697_v42, %v1696_v37  ;;  %v624_v48 = vadd.f32 %v1717_v44, %v583_v43 }
 0x129   :  { %v1719_v32 = vpop.f32.mrf.mxu1 }
 0x12a   :  { %v586_v49 = vadd.f32 %v1698_v45, %v1544_v41  ;;  %v1720_v50 = vadd.f32 %v1719_v32, %v1718_v30  ;;  %v750_v30 = vshrl.u32 %v749_v29, 7 }
 0x12b   :  { %v705_v33 = vpop.f32.mrf.mxu1 }
 0x12c   :  { %v627_v55 = vadd.f32 %v1720_v50, %v586_v49  ;;  %v755_v31 = vsub.s32 1, %v750_v30  ;;  %v763_v32 = vsub.s32 3, %v750_v30  ;;  %v759_v34 = vsub.s32 2, %v750_v30 }
 0x12d   :  { %v1802_v35 = vpop.f32.mrf.mxu1 }
 0x12e   :  { %v747_v35 = vld [vmem:[%s2239_s4] sm:$0xf] }
 0x12f   :  { %v708_v36 = vpop.f32.mrf.mxu1  ;;  %v764_v40 = vrot.slane %v747_v35, %v763_v32  ;;  %v760_v42 = vrot.slane %v747_v35, %v759_v34  ;;  %v1667_v32 = vld [vmem:[%s2243_s8] ss:$0 sm:$0xff]  ;;  %s2090_s8 = scalar_lea.vmem %s1534_s20, 16 }
 0x130   :  { %p2091_p11 = scmp.ne.s32.totalorder %s1534_s20, %s2090_s8  ;;  %p2096_p13 = scmp.lt.s32.totalorder %s2094_s21, %s2090_s8 }
 0x131   :  { %v1803_v39 = vpop.f32.mrf.mxu1 }
 0x132   :  { %v756_v39 = vrot.slane %v747_v35, %v755_v31  ;;  %p2097_p0 = por %p2096_p13, %p2095_p12 }
 0x134   :  { %p2098_p1 = pnand %p2097_p0, %p2091_p11 }
 0x141   :  { %v1737_v46 = vpop.f32.mrf.mxu0 }
 0x143   :  { %v1738_v47 = vpop.f32.mrf.mxu0 }
 0x144   :  { %v1739_v51 = vadd.f32 %v1738_v47, %v1737_v46 }
 0x145   :  { %v1740_v52 = vpop.f32.mrf.mxu0 }
 0x146   :  { %v665_v53 = vadd.f32 %v1739_v51, %v624_v48 }
 0x147   :  { %v1741_v54 = vpop.f32.mrf.mxu0 }
 0x148   :  { %v1742_v56 = vadd.f32 %v1741_v54, %v1740_v52  ;;  %v706_v57 = vadd.f32 %v705_v33, %v665_v53  ;;  %v751_v33 = vsub.s32 0, %v750_v30 }
 0x14a   :  { %v668_v58 = vadd.f32 %v1742_v56, %v627_v55  ;;  %v712_v60 = vmax.f32 %v706_v57, 0.0  ;;  %v752_v41 = vrot.slane %v747_v35, %v751_v33 }
 0x14c   :  { %v709_v59 = vadd.f32 %v708_v36, %v668_v58 }
 0x14e   :  { %v713_v61 = vmax.f32 %v709_v59, 0.0 }
 0x150   :  { %v714_v0 = vpack.c.bf16 %v713_v61, %v712_v60 }
 0x152   :  { %962 = vmatmul.mubr.bf16.vlgmr.msra.gmra.mxu1 %v714_v0  ;;  %1005 = vmatmul.mubr.bf16.vlgmr.msra.gmra.mxu0 %v714_v0 }
 0x153   :  { %1746 = vmatpush3.bf16.msra.mxu1 %v1948_v62  ;;  %1768 = vmatpush3.bf16.msra.mxu0 %v1949_v63 }
 0x154   :  { %1747 = vmatprep.subr.bf16.mxu1 %v1950_v1  ;;  %1769 = vmatprep.subr.bf16.mxu0 %v1951_v2 }
 0x157   :  { %1748 = vmatpush3.bf16.msra.mxu1 %v1952_v3  ;;  %1770 = vmatpush3.bf16.msra.mxu0 %v1953_v4  ;;  %v1978_v3 = vld [vmem:[#allocation10 + $0x38] sm:$0xff]  }
 0x158   :  { %1749 = vmatprep.subr.bf16.mxu1 %v1954_v5  ;;  %1771 = vmatprep.subr.bf16.mxu0 %v1955_v6  ;;  %v1979_v6 = vld [vmem:[#allocation10 + $0x30] sm:$0xff]  }
 0x15b   :  { %1750 = vmatpush3.bf16.msra.mxu1 %v1956_v7  ;;  %1772 = vmatpush3.bf16.msra.mxu0 %v1957_v8  ;;  %v1980_v7 = vld [vmem:[#allocation10 + $0x28] sm:$0xff]   ;;  %v1981_v8 = vld [vmem:[#allocation10 + $0x20] sm:$0xff]  }
 0x15c   :  { %1751 = vmatprep.subr.bf16.mxu1 %v1958_v9  ;;  %1773 = vmatprep.subr.bf16.mxu0 %v1959_v10  ;;  %v1982_v9 = vld [vmem:[#allocation10 + $0x18] sm:$0xff]   ;;  %v1983_v10 = vld [vmem:[#allocation10 + $0x10] sm:$0xff]  }
 0x15f   :  { %1752 = vmatpush3.bf16.msra.mxu1 %v1960_v11  ;;  %1774 = vmatpush3.bf16.msra.mxu0 %v1961_v12  ;;  %v1984_v11 = vld [vmem:[#allocation10 + $0x8] sm:$0xff]   ;;  %v1985_v12 = vld [vmem:[#allocation10] sm:$0xff]  }
 0x160   :  { %1753 = vmatprep.subr.bf16.mxu1 %v1962_v13  ;;  %1775 = vmatprep.subr.bf16.mxu0 %v1963_v14 }
 0x163   :  { %1754 = vmatpush3.bf16.msra.mxu1 %v1964_v15  ;;  %1776 = vmatpush3.bf16.msra.mxu0 %v1965_v16  ;;  %v1634_v15 = vld [vmem:[%s2241_s6] ss:$0 sm:$0xff] }
 0x164   :  { %1755 = vmatprep.subr.bf16.mxu1 %v1966_v17  ;;  %1777 = vmatprep.subr.bf16.mxu0 %v1967_v18 }
 0x167   :  { %1756 = vmatpush3.bf16.msra.mxu1 %v1968_v19  ;;  %1778 = vmatpush3.bf16.msra.mxu0 %v1969_v20 }
 0x168   :  { %1757 = vmatprep.subr.bf16.mxu1 %v1970_v21  ;;  %1779 = vmatprep.subr.bf16.mxu0 %v1971_v22 }
 0x16b   :  { %1758 = vmatpush3.bf16.msra.mxu1 %v1972_v23  ;;  %1780 = vmatpush3.bf16.msra.mxu0 %v1973_v24 }
 0x16c   :  { %1759 = vmatprep.subr.bf16.mxu1 %v1974_v25  ;;  %1781 = vmatprep.subr.bf16.mxu0 %v1975_v26 }
 0x16f   :  { %1760 = vmatpush3.bf16.msra.mxu1 %v1976_v27  ;;  %1782 = vmatpush3.bf16.msra.mxu0 %v1977_v28 }
 0x170   :  { %1804 = vmatprep.subr.bf16.mxu1 %v2129_v38 }
 0x212   :  { %v963_v36 = vpop.f32.mrf.mxu1  ;;  %v1006_v37 = vpop.f32.mrf.mxu0 }
 0x213   :  { %v964_v51 = vadd.f32 %v963_v36, %v752_v41  ;;  %v1007_v52 = vadd.f32 %v1006_v37, %v760_v42 }
 0x214   :  { %v965_v43 = vpop.f32.mrf.mxu1  ;;  %v1008_v44 = vpop.f32.mrf.mxu0 }
 0x215   :  { %v966_v47 = vadd.f32 %v965_v43, %v756_v39  ;;  %v1009_v48 = vadd.f32 %v1008_v44, %v764_v40  ;;  %v1015_v63 = vmax.f32 %v964_v51, 0.0  ;;  %v1017_v0 = vmax.f32 %v1007_v52, 0.0 }
 0x216   :  { %v967_v45 = vpop.f32.mrf.mxu1  ;;  %v1010_v46 = vpop.f32.mrf.mxu0 }
 0x217   :  { %v968_v49 = vadd.f32 %v967_v45, %v752_v41  ;;  %v1011_v50 = vadd.f32 %v1010_v46, %v760_v42  ;;  %v1016_v59 = vmax.f32 %v966_v47, 0.0  ;;  %v1018_v60 = vmax.f32 %v1009_v48, 0.0 }
 0x218   :  { %v969_v53 = vpop.f32.mrf.mxu1  ;;  %v1012_v54 = vpop.f32.mrf.mxu0 }
 0x219   :  { %v970_v55 = vadd.f32 %v969_v53, %v756_v39  ;;  %v1013_v56 = vadd.f32 %v1012_v54, %v764_v40  ;;  %v1019_v57 = vmax.f32 %v968_v49, 0.0  ;;  %v1021_v58 = vmax.f32 %v1011_v50, 0.0 }
 0x21b   :  { %v1020_v61 = vmax.f32 %v970_v55, 0.0  ;;  %v1022_v62 = vmax.f32 %v1013_v56, 0.0  ;;  %v1023_v4 = vpack.c.bf16 %v1019_v57, %v1015_v63  ;;  %v1025_v5 = vpack.c.bf16 %v1021_v58, %v1017_v0 }
 0x21d   :  { %v1024_v1 = vpack.c.bf16 %v1020_v61, %v1016_v59  ;;  %v1026_v2 = vpack.c.bf16 %v1022_v62, %v1018_v60 }
 0x21f   :  { %1322 = vmatprep.mubr.bf16.mxu1 %v1024_v1  ;;  %1363 = vmatprep.mubr.bf16.mxu0 %v1026_v2 }
 0x220   :  { %1323 = vmatmul.mubr.bf16.vlgmr.msra.gmra.mxu1 %v1023_v4  ;;  %1364 = vmatmul.mubr.bf16.vlgmr.msra.gmra.mxu0 %v1025_v5 }
 0x221   :  { %1805 = vmatpush3.bf16.msra.mxu1 %v1978_v3  ;;  %1820 = vmatprep.mubr.msk.bf16.mxu1 %vm2130_vm0, %v2129_v38 }
 0x222   :  { %1806 = vmatprep.subr.bf16.mxu1 %v2129_v38 }
 0x225   :  { %1807 = vmatpush3.bf16.msra.mxu1 %v1979_v6 }
 0x226   :  { %1808 = vmatprep.subr.bf16.mxu1 %v2129_v38 }
 0x229   :  { %1809 = vmatpush3.bf16.msra.mxu1 %v1980_v7 }
 0x22a   :  { %1810 = vmatprep.subr.bf16.mxu1 %v2129_v38 }
 0x22d   :  { %1811 = vmatpush3.bf16.msra.mxu1 %v1981_v8 }
 0x22e   :  { %1812 = vmatprep.subr.bf16.mxu1 %v2129_v38 }
 0x231   :  { %1813 = vmatpush3.bf16.msra.mxu1 %v1982_v9 }
 0x232   :  { %1814 = vmatprep.subr.bf16.mxu1 %v2129_v38 }
 0x235   :  { %1815 = vmatpush3.bf16.msra.mxu1 %v1983_v10 }
 0x236   :  { %1816 = vmatprep.subr.bf16.mxu1 %v2129_v38 }
 0x239   :  { %1817 = vmatpush3.bf16.msra.mxu1 %v1984_v11 }
 0x23a   :  { %1818 = vmatprep.subr.bf16.mxu1 %v2129_v38 }
 0x23d   :  { %1819 = vmatpush3.bf16.msra.mxu1 %v1985_v12 }
 0x2e0   :  { %v1761_v13 = vpop.f32.mrf.mxu1  ;;  %v1783_v14 = vpop.f32.mrf.mxu0 }
 0x2e2   :  { %v1762_v16 = vpop.f32.mrf.mxu1  ;;  %v1784_v17 = vpop.f32.mrf.mxu0 }
 0x2e3   :  { %v1763_v18 = vadd.f32 %v1762_v16, %v1761_v13  ;;  %v1785_v24 = vadd.f32 %v1784_v17, %v1783_v14 }
 0x2e4   :  { %v1764_v19 = vpop.f32.mrf.mxu1  ;;  %v1786_v20 = vpop.f32.mrf.mxu0 }
 0x2e5   :  { %v1325_v21 = vadd.f32 %v1763_v18, %v1634_v15 }
 0x2e6   :  { %v1765_v22 = vpop.f32.mrf.mxu1  ;;  %v1787_v23 = vpop.f32.mrf.mxu0 }
 0x2e7   :  { %v1766_v25 = vadd.f32 %v1765_v22, %v1764_v19  ;;  %v1366_v26 = vadd.f32 %v1785_v24, %v1325_v21  ;;  %v1788_v27 = vadd.f32 %v1787_v23, %v1786_v20 }
 0x2e9   :  { %v1328_v38 = vadd.f32 %v1766_v25, %v1634_v15  ;;  %v1372_v29 = vmax.f32 %v1366_v26, 0.0 }
 0x2eb   :  { %v1369_v28 = vadd.f32 %v1788_v27, %v1328_v38 }
 0x2ed   :  { %v1373_v30 = vmax.f32 %v1369_v28, 0.0 }
 0x2ef   :  { %v1374_v31 = vpack.c.bf16 %v1373_v30, %v1372_v29 }
 0x2f1   :  { %1821 = vmatmul.mubr.bf16.vlgmr.msra.gmra.mxu1 %v1374_v31 }
 0x3b1   :  { %v1480_v33 = vpop.f32.mrf.mxu1 }
 0x3b2   :  { %v1481_v34 = vadd.f32 %v1667_v32, %v1480_v33 }
 0x3b3   :  { %v1822_v35 = vpop.f32.mrf.mxu1 }
 0x3b4   :  { %1487 = vxpose.xlu0.b32.start [1/2] (short) (narrow) %v1481_v34, 8 }
 0x3b5   :  { %v1483_v36 = vpop.f32.mrf.mxu1 }
 0x3b6   :  { %v1484_v37 = vadd.f32 %v1667_v32, %v1483_v36 }
 0x3b7   :  { %v1823_v39 = vpop.f32.mrf.mxu1 }
 0x3b8   :  { %1488 = vxpose.xlu0.b32.end [2/2] (short) (narrow) %v1484_v37, 8 }
 0x430   :  { %v1503_v40 = vpop.trf.xlu0 }
 0x431   :  { %v1676_v41 = vmul.f32 -1.442695, %v1503_v40 }
 0x433   :  { %1986 = vpow2.f32 %v1676_v41 }
 0x440   :  { %v1987_v42 = vpop.eup %1986 }
 0x441   :  { %v1522_v43 = vadd.f32 1.0, %v1987_v42 }
 0x443   :  { %1988 = vrcp.f32 %v1522_v43 }
 0x450   :  { %v1989_v44 = vpop.eup %1988 }
 0x451   :  { %1526 = vst.msk [vmem:[#allocation11] sm:$0x1] %vm1525_vm2, %v1989_v44 }
 0x452   :  { %2101 = shalt.err (!%p2098_p1)
}
 0x453   :  { %1536 = dma.vmem_to_hbm [thread:$0]  %s1534_s20, 16, %s2244_s9, [#allocation4]  }
 0x454   :  { %2116 = dma.done.wait [#allocation4], 16  }
 0x455   :  { %2117 = vsyncadd [#allocation4], 4294967280 }
 0x456   :  { %1540 = vsyncpa [#allocation3], 1 }
 0x457   :  { %1541 = vsyncpa [#allocation6], 1 }
 0x458   :  { %1542 = vsyncpa [#allocation9], 1 }
 0x459   :  { %1543 = vsyncpa [#allocation4], 1 }

</bundles_post_ra>
